<compile_context>
chip_gen: v7x
topology: tpu7x:2x2x1
jax: 0.10.0
libtpu: 0.0.40
codegen_flags: <defaults>
</compile_context>

<pallas_src>
import functools
import math

import jax
import jax.numpy as jnp
from jax import lax
from jax.experimental import pallas as pl
from jax.experimental.pallas import tpu as pltpu


_VMEM_LIMIT = 48 * 1024 * 1024      # scoped VMEM limit; <= v7x's 64 MiB physical
_GEMM_VMEM_BUDGET = 40 * 1024 * 1024
_ATTN_VMEM_BUDGET = 20 * 1024 * 1024


# ---------------------------------------------------------------------------
# block-size helpers (respect the (8, 128) tiling constraint)
# ---------------------------------------------------------------------------

def _sublane_block(dim, tile):
    """Second-to-last block dim: multiple of 8 dividing `dim`, else full dim."""
    t = tile
    while t >= 8:
        if dim % t == 0:
            return t
        t //= 2
    return dim


def _lane_block(dim, tile):
    """Last block dim: multiple of 128 dividing `dim`, else full dim."""
    t = tile
    while t >= 128:
        if dim % t == 0:
            return t
        t //= 2
    return dim


# ---------------------------------------------------------------------------
# Tiled GEMM (P1 + P3: f32 accumulator, reduction axis last / "arbitrary")
# ---------------------------------------------------------------------------

def _matmul_kernel(x_ref, w_ref, o_ref, acc_ref):
    @pl.when(pl.program_id(2) == 0)
    def _():
        acc_ref[...] = jnp.zeros(acc_ref.shape, acc_ref.dtype)

    acc_ref[...] += jnp.dot(x_ref[...], w_ref[...],
                            preferred_element_type=jnp.float32)

    @pl.when(pl.program_id(2) == pl.num_programs(2) - 1)
    def _():
        o_ref[...] = acc_ref[...].astype(o_ref.dtype)


def _fit_gemm_blocks(M, K, Nout, in_b, out_b, tm, tn, tk, budget):
    """Pick (bm, bn, bk) honoring divisibility and a conservative VMEM budget."""
    bm = _sublane_block(M, tm)
    bk = _lane_block(K, tk)
    bn = _lane_block(Nout, tn)

    def usage(bm_, bn_, bk_):
        # double-buffered A & B tiles + f32 accumulator + double-buffered out tile
        return (2 * (bm_ * bk_ + bk_ * bn_) * in_b
                + bm_ * bn_ * 4
                + 2 * bm_ * bn_ * out_b)

    while usage(bm, bn, bk) > budget:
        progressed = False
        if bn > 128:
            nxt = _lane_block(Nout, bn // 2)
            if nxt < bn:
                bn, progressed = nxt, True
        if not progressed and bk > 128:
            nxt = _lane_block(K, bk // 2)
            if nxt < bk:
                bk, progressed = nxt, True
        if not progressed and bm > 8:
            nxt = _sublane_block(M, bm // 2)
            if nxt < bm:
                bm, progressed = nxt, True
        if not progressed:
            break
    return bm, bn, bk


def matmul(x2d, w, *, out_dtype=None, tm=512, tn=None, tk=512):
    """y = x2d @ w  (w already laid out as (K, Nout)); f32 accumulation.

    tn=None defaults to the full output width, collapsing the j grid axis so
    the activation matrix is streamed from HBM exactly once (budget-guarded).
    """
    M, K = x2d.shape
    K2, Nout = w.shape
    assert K == K2
    out_dtype = out_dtype or x2d.dtype
    if tn is None:
        tn = Nout

    in_b = jnp.dtype(x2d.dtype).itemsize
    out_b = jnp.dtype(out_dtype).itemsize
    bm, bn, bk = _fit_gemm_blocks(M, K, Nout, in_b, out_b, tm, tn, tk,
                                  _GEMM_VMEM_BUDGET)

    g_i, g_j, g_k = M // bm, Nout // bn, K // bk
    cost = pl.CostEstimate(
        flops=2 * M * Nout * K,
        transcendentals=0,
        # A is re-read once per j tile, B once per i tile; C written once.
        bytes_accessed=(M * K * g_j + K * Nout * g_i) * in_b
        + M * Nout * out_b,
    )

    return pl.pallas_call(
        _matmul_kernel,
        out_shape=jax.ShapeDtypeStruct((M, Nout), out_dtype),
        grid_spec=pltpu.PrefetchScalarGridSpec(
            num_scalar_prefetch=0,
            grid=(g_i, g_j, g_k),
            in_specs=[
                pl.BlockSpec((bm, bk), lambda i, j, k: (i, k)),
                pl.BlockSpec((bk, bn), lambda i, j, k: (k, j)),
            ],
            out_specs=pl.BlockSpec((bm, bn), lambda i, j, k: (i, j)),
            scratch_shapes=[pltpu.VMEM((bm, bn), jnp.float32)],
        ),
        compiler_params=pltpu.CompilerParams(
            dimension_semantics=("parallel", "parallel", "arbitrary"),
            vmem_limit_bytes=_VMEM_LIMIT,
        ),
        cost_estimate=cost,
    )(x2d, w)


# ---------------------------------------------------------------------------
# Flash-style attention (online softmax, heads batched per grid step)
# ---------------------------------------------------------------------------

def _flash_attn_kernel(q_ref, k_ref, v_ref, o_ref, m_ref, l_ref, acc_ref,
                       *, is_masked):
    qi = pl.program_id(1)
    kj = pl.program_id(2)

    @pl.when(kj == 0)
    def _init():
        m_ref[...] = jnp.full(m_ref.shape, -jnp.inf, m_ref.dtype)
        l_ref[...] = jnp.zeros(l_ref.shape, l_ref.dtype)
        acc_ref[...] = jnp.zeros(acc_ref.shape, acc_ref.dtype)

    def _compute():
        q = q_ref[0]                  # (H, tq, d_q); 1/sqrt(d_k) folded into W_q
        k = k_ref[0]                  # (H, tk, d_k)
        v = v_ref[0]                  # (H, tk, d_v)

        # QK^T via dot_general contracting the last dims -> no k.T relayout.
        s = jnp.einsum("hqd,hkd->hqk", q, k,
                       preferred_element_type=jnp.float32)   # (H, tq, tk) f32

        # TODO(synk): nn.Dropout on the attention scores is identity here
        # (inference behavior); training-mode dropout is not implemented.

        if is_masked:
            # Only the diagonal block (kj == qi) needs masking; below-diagonal
            # blocks are fully visible and above-diagonal blocks are skipped.
            # Static (tq, tk) lower-triangular mask, broadcast over heads.
            tq, tk = s.shape[1], s.shape[2]
            row = lax.broadcasted_iota(jnp.int32, (tq, tk), 0)
            col = lax.broadcasted_iota(jnp.int32, (tq, tk), 1)
            keep = jnp.logical_or(col <= row, kj < qi)
            # Large finite negative instead of -inf keeps the online softmax
            # NaN-free; exp underflows to exactly 0 either way.
            s = jnp.where(keep[None, :, :], s, -1e30)

        m_prev = m_ref[...]                                   # (H, tq, 1)
        m_cur = jnp.max(s, axis=-1, keepdims=True)
        m_new = jnp.maximum(m_prev, m_cur)
        alpha = jnp.exp(m_prev - m_new)
        p = jnp.exp(s - m_new)
        l_ref[...] = alpha * l_ref[...] + jnp.sum(p, axis=-1, keepdims=True)
        acc_ref[...] = alpha * acc_ref[...] + jnp.einsum(
            "hqk,hkd->hqd", p.astype(v.dtype), v,
            preferred_element_type=jnp.float32)
        m_ref[...] = m_new

    if is_masked:
        # Causal skip: KV blocks entirely above the diagonal (kj > qi, tq == tk)
        # contribute nothing.  Guard uses the UN-clamped kj on purpose.
        pl.when(kj <= qi)(_compute)
    else:
        _compute()

    @pl.when(kj == pl.num_programs(2) - 1)
    def _finalize():
        inv_l = pl.reciprocal(l_ref[...], approx=True)        # EUP slot, ~free
        o_ref[...] = (acc_ref[...] * inv_l)[None].astype(o_ref.dtype)


def _attn_tile(L, H, dq, dv):
    """Largest tq (== tk) dividing L, capped at 256, fitting a VMEM budget."""
    tq = _sublane_block(L, 256)
    while True:
        temps = (2 * H * tq * tq * 4                 # s, p f32 temporaries
                 + H * tq * (dv + 2) * 4             # acc, m, l f32 scratch
                 + 2 * H * tq * (2 * dq + dv) * 2    # double-buffered Q/K/V (bf16)
                 + 2 * H * tq * dv * 4)              # double-buffered out block
        if temps <= _ATTN_VMEM_BUDGET or tq <= 8:
            return tq
        nxt = _sublane_block(L, tq // 2)
        if nxt >= tq:
            return tq
        tq = nxt


def attention(q4, k4, v4, *, is_masked, out_dtype=None):
    """q4/k4/v4: (N, H, L, d). Returns (N, H, L, d_v).  Scale pre-folded into Q."""
    N, H, L, dq = q4.shape
    dv = v4.shape[-1]
    out_dtype = out_dtype or q4.dtype

    tq = _attn_tile(L, H, dq, dv)
    tk = tq                               # tq == tk keeps the causal-skip rule simple
    nq = L // tq
    nk = L // tk

    q_map = lambda n, i, j: (n, 0, i, 0)
    if is_masked:
        # Clamp K/V to the diagonal: above-diagonal blocks alias the previous
        # block index, so their HBM DMA is elided (compute is skipped anyway).
        kv_map = lambda n, i, j: (n, 0, jnp.minimum(j, i), 0)
    else:
        kv_map = lambda n, i, j: (n, 0, j, 0)

    kern = functools.partial(_flash_attn_kernel, is_masked=is_masked)

    in_b = jnp.dtype(q4.dtype).itemsize
    out_b = jnp.dtype(out_dtype).itemsize
    exec_pairs = (nq * (nq + 1)) // 2 if is_masked else nq * nk
    cost = pl.CostEstimate(
        flops=2 * N * H * exec_pairs * tq * tk * (dq + dv),
        transcendentals=N * H * exec_pairs * tq * tk,
        bytes_accessed=in_b * N * H * (L * dq + exec_pairs * tk * (dq + dv))
        + out_b * N * H * L * dv,
    )

    return pl.pallas_call(
        kern,
        out_shape=jax.ShapeDtypeStruct((N, H, L, dv), out_dtype),
        grid_spec=pltpu.PrefetchScalarGridSpec(
            num_scalar_prefetch=0,
            grid=(N, nq, nk),
            in_specs=[
                pl.BlockSpec((1, H, tq, dq), q_map),
                pl.BlockSpec((1, H, tk, dq), kv_map),
                pl.BlockSpec((1, H, tk, dv), kv_map),
            ],
            out_specs=pl.BlockSpec((1, H, tq, dv), q_map),
            scratch_shapes=[
                pltpu.VMEM((H, tq, 1), jnp.float32),    # running max m
                pltpu.VMEM((H, tq, 1), jnp.float32),    # running denom l
                pltpu.VMEM((H, tq, dv), jnp.float32),   # running weighted sum
            ],
        ),
        compiler_params=pltpu.CompilerParams(
            dimension_semantics=("parallel", "parallel", "arbitrary"),
            vmem_limit_bytes=_VMEM_LIMIT,
        ),
        cost_estimate=cost,
    )(q4, k4, v4)


# ---------------------------------------------------------------------------
# Module wrapper
# ---------------------------------------------------------------------------

class SelfAttentionPallas:
    def __init__(self, embed_dim, num_heads, d_k=None, d_v=None, dropout=0.1,
                 mask=True, key=None, compute_dtype=jnp.bfloat16):
        if key is None:
            key = jax.random.PRNGKey(0)
        self.embed_dim = embed_dim
        self.num_heads = num_heads
        if d_k is None or d_v is None:
            assert embed_dim % num_heads == 0
        self.d_k = d_k if d_k is not None else embed_dim // num_heads
        self.d_v = d_v if d_v is not None else embed_dim // num_heads
        self.d_q = self.d_k
        self.is_masked = mask
        self.compute_dtype = compute_dtype   # jnp.bfloat16 (default) or jnp.float32

        k1, k2, k3, k4 = jax.random.split(key, 4)

        def _init(k, fan_in, fan_out):
            # torch nn.Linear default init: U(-1/sqrt(fan_in), 1/sqrt(fan_in)),
            # stored pre-transposed as (fan_in, fan_out).
            bound = 1.0 / math.sqrt(fan_in)
            return jax.random.uniform(
                k, (fan_in, fan_out), jnp.float32, -bound, bound)

        wq = _init(k1, embed_dim, self.d_q * num_heads)
        wk = _init(k2, embed_dim, self.d_k * num_heads)
        wv = _init(k3, embed_dim, self.d_v * num_heads)
        self.wq, self.wk, self.wv = wq, wk, wv            # unscaled, for the reference
        # Fused QKV weight with 1/sqrt(d_k) folded into the Q columns:
        # one GEMM reads x once; no per-step q scaling in the attention kernel.
        scale = 1.0 / math.sqrt(self.d_k)
        self.w_qkv = jnp.concatenate([wq * scale, wk, wv], axis=1)
        self.wo = _init(k4, self.d_v * num_heads, embed_dim)

    def __call__(self, x):
        N, L, E = x.shape
        assert E == self.embed_dim
        H, dq, dk, dv = self.num_heads, self.d_q, self.d_k, self.d_v
        cd = self.compute_dtype
        out_dtype = x.dtype

        x2 = x.reshape(N * L, E).astype(cd)

        # One fused projection GEMM producing [Q*scale | K | V]; bn == full width
        # so x is streamed from HBM exactly once.
        qkv = matmul(x2, self.w_qkv.astype(cd), out_dtype=cd)   # (N*L, H*(dq+dk+dv))
        q = qkv[:, : H * dq]
        k = qkv[:, H * dq: H * (dq + dk)]
        v = qkv[:, H * (dq + dk):]

        # torch `.view(N, H, L, d)` on the (N, L, H*d) projection output is a
        # plain row-major reinterpretation (no head/seq transpose).
        q4 = q.reshape(N, H, L, dq)
        k4 = k.reshape(N, H, L, dk)
        v4 = v.reshape(N, H, L, dv)

        wei = attention(q4, k4, v4, is_masked=self.is_masked,
                        out_dtype=cd)                           # (N, H, L, dv)

        # torch: wei.reshape(N, L, dv*H) then fc_out (row-major reshape).
        wei2 = wei.reshape(N * L, H * dv)
        out = matmul(wei2, self.wo.astype(cd), out_dtype=out_dtype)
        return out.reshape(N, L, self.embed_dim)

    # pure-JAX f32 reference with identical semantics (for validation)
    def reference(self, x):
        N, L, E = x.shape
        q = (x.reshape(N * L, E) @ self.wq).reshape(N, self.num_heads, L, self.d_q)
        k = (x.reshape(N * L, E) @ self.wk).reshape(N, self.num_heads, L, self.d_k)
        v = (x.reshape(N * L, E) @ self.wv).reshape(N, self.num_heads, L, self.d_v)
        s = jnp.einsum("nhld,nhmd->nhlm", q, k) / math.sqrt(self.d_k)
        if self.is_masked:
            causal = jnp.tril(jnp.ones((L, L), bool))
            s = jnp.where(causal, s, -jnp.inf)
        p = jax.nn.softmax(s, axis=-1)
        wei = jnp.einsum("nhlm,nhmd->nhld", p, v)
        out = wei.reshape(N * L, self.num_heads * self.d_v) @ self.wo
        return out.reshape(N, L, self.embed_dim)


if __name__ == "__main__":
    key = jax.random.PRNGKey(0)
    k_x, k_w, k_x2 = jax.random.split(key, 3)

    N, L, E, H = 2, 8, 32, 4
    x = jax.random.normal(k_x, (N, L, E), dtype=jnp.float32)

    # default (bf16 compute) masked / decoder path
    mod = SelfAttentionPallas(embed_dim=E, num_heads=H, mask=True, key=k_w)
    out = jax.block_until_ready(mod(x))
    ref = mod.reference(x)
    assert out.shape == (N, L, E) and out.dtype == x.dtype
    assert jnp.allclose(out, ref, atol=1e-1, rtol=1e-1), "bf16 masked mismatch"

    # f32 compute path, tighter tolerance
    mod_f32 = SelfAttentionPallas(embed_dim=E, num_heads=H, mask=True, key=k_w,
                                  compute_dtype=jnp.float32)
    out32 = jax.block_until_ready(mod_f32(x))
    assert jnp.allclose(out32, ref, atol=2e-2, rtol=2e-2), "f32 masked mismatch"

    # unmasked / encoder path
    mod_enc = SelfAttentionPallas(embed_dim=E, num_heads=H, mask=False, key=k_w,
                                  compute_dtype=jnp.float32)
    out_enc = jax.block_until_ready(mod_enc(x))
    ref_enc = mod_enc.reference(x)
    assert jnp.allclose(out_enc, ref_enc, atol=2e-2, rtol=2e-2), "unmasked mismatch"

    # Longer sequence exercising multiple causal KV blocks (diagonal-only mask,
    # clamped K/V index map with DMA elision, above-diagonal block skipping).
    N2, L2, E2, H2 = 1, 512, 128, 4
    x_long = jax.random.normal(k_x2, (N2, L2, E2), dtype=jnp.float32)
    mod_long = SelfAttentionPallas(embed_dim=E2, num_heads=H2, mask=True, key=k_w,
                                   compute_dtype=jnp.float32)
    out_long = jax.block_until_ready(mod_long(x_long))
    ref_long = mod_long.reference(x_long)
    assert jnp.allclose(out_long, ref_long, atol=2e-2, rtol=2e-2), \
        "long-sequence masked mismatch"

    print("KERNEL_OK")
</pallas_src>

<mosaic_0001>
module attributes {stable_mosaic.version = 11 : i64} {
  func.func @_matmul_kernel(%arg0: i32, %arg1: i32, %arg2: i32, %arg3: memref<16x32xbf16, #tpu.memory_space<vmem>>, %arg4: memref<32x96xbf16, #tpu.memory_space<vmem>>, %arg5: memref<16x96xbf16, #tpu.memory_space<vmem>>, %arg6: memref<16x96xf32, #tpu.memory_space<vmem>>) attributes {dimension_semantics = [#tpu.dimension_semantics<parallel>, #tpu.dimension_semantics<parallel>, #tpu.dimension_semantics<arbitrary>], iteration_bounds = array<i64: 1, 1, 1>, scalar_prefetch = 0 : i64, scratch_operands = 1 : i64, tpu.core_type = #tpu.core_type<tc>, window_params = [{transform_indices = @transform_0, window_bounds = array<i64: 16, 32>}, {transform_indices = @transform_1, window_bounds = array<i64: 32, 96>}, {transform_indices = @transform_2, window_bounds = array<i64: 16, 96>}]} {
    %c0_i32 = arith.constant 0 : i32
    %0 = arith.cmpi eq, %arg2, %c0_i32 : i32
    %1 = arith.extui %0 : i1 to i32
    %c0_i32_0 = arith.constant 0 : i32
    %2 = arith.cmpi ne, %1, %c0_i32_0 : i32
    scf.if %2 {
      %cst_10 = arith.constant 0.000000e+00 : f32
      %12 = vector.broadcast %cst_10 : f32 to vector<16x96xf32>
      %c0_11 = arith.constant 0 : index
      %c0_12 = arith.constant 0 : index
      %13 = vector.load %arg6[%c0_11, %c0_12] : memref<16x96xf32, #tpu.memory_space<vmem>>, vector<16x96xf32>
      tpu.vector_store %arg6[%c0_11, %c0_12], %12 {strides = array<i32>} : memref<16x96xf32, #tpu.memory_space<vmem>>, vector<16x96xf32>,
    } else {
    }
    %c0 = arith.constant 0 : index
    %c0_1 = arith.constant 0 : index
    %3 = vector.load %arg6[%c0, %c0_1] : memref<16x96xf32, #tpu.memory_space<vmem>>, vector<16x96xf32>
    %c0_2 = arith.constant 0 : index
    %c0_3 = arith.constant 0 : index
    %4 = vector.load %arg3[%c0_2, %c0_3] : memref<16x32xbf16, #tpu.memory_space<vmem>>, vector<16x32xbf16>
    %c0_4 = arith.constant 0 : index
    %c0_5 = arith.constant 0 : index
    %5 = vector.load %arg4[%c0_4, %c0_5] : memref<32x96xbf16, #tpu.memory_space<vmem>>, vector<32x96xbf16>
    %cst = arith.constant dense<0.000000e+00> : vector<16x96xf32>
    %6 = tpu.matmul %4, %5, %cst {dimension_numbers = #tpu.dot_dimension_numbers<[1], [0], [0], [1], [0, 0, 1, 1], [], []>} : vector<16x32xbf16>, vector<32x96xbf16>, vector<16x96xf32> -> vector<16x96xf32>
    %7 = arith.addf %3, %6 : vector<16x96xf32>
    %c0_6 = arith.constant 0 : index
    %c0_7 = arith.constant 0 : index
    %8 = vector.load %arg6[%c0_6, %c0_7] : memref<16x96xf32, #tpu.memory_space<vmem>>, vector<16x96xf32>
    tpu.vector_store %arg6[%c0_6, %c0_7], %7 {strides = array<i32>} : memref<16x96xf32, #tpu.memory_space<vmem>>, vector<16x96xf32>,
    %c0_i32_8 = arith.constant 0 : i32
    %9 = arith.cmpi eq, %arg2, %c0_i32_8 : i32
    %10 = arith.extui %9 : i1 to i32
    %c0_i32_9 = arith.constant 0 : i32
    %11 = arith.cmpi ne, %10, %c0_i32_9 : i32
    scf.if %11 {
      %c0_10 = arith.constant 0 : index
      %c0_11 = arith.constant 0 : index
      %12 = vector.load %arg6[%c0_10, %c0_11] : memref<16x96xf32, #tpu.memory_space<vmem>>, vector<16x96xf32>
      %13 = arith.truncf %12 : vector<16x96xf32> to vector<16x96xbf16>
      %c0_12 = arith.constant 0 : index
      %c0_13 = arith.constant 0 : index
      %14 = vector.load %arg5[%c0_12, %c0_13] : memref<16x96xbf16, #tpu.memory_space<vmem>>, vector<16x96xbf16>
      tpu.vector_store %arg5[%c0_12, %c0_13], %13 {strides = array<i32>} : memref<16x96xbf16, #tpu.memory_space<vmem>>, vector<16x96xbf16>,
    } else {
    }
    return
  }
  func.func @transform_0(%arg0: i32, %arg1: i32, %arg2: i32) -> (i32, i32) {
    %c0_i32 = arith.constant 0 : i32
    return %arg0, %arg2 : i32, i32
  }
  func.func @transform_1(%arg0: i32, %arg1: i32, %arg2: i32) -> (i32, i32) {
    %c0_i32 = arith.constant 0 : i32
    return %arg2, %arg1 : i32, i32
  }
  func.func @transform_2(%arg0: i32, %arg1: i32, %arg2: i32) -> (i32, i32) {
    %c0_i32 = arith.constant 0 : i32
    return %arg0, %arg1 : i32, i32
  }
}

</mosaic_0001>

<bundles_post_ra>
// kernel: tpu_custom_call.1
= control target key start
LH: loop header
LB: loop body
LE: loop exit
PB: predicated region body
PF: predicated region fallthrough
CT: control target
= control target key end

     0   :  { %7 = vsyncpa [#allocation4], 0  ;;  %s329_s0 = inlined_call_operand.hbm [shape: bf16[16,32], index: 0, kind: input, shape index: {}]   ;;  %s330_s1 = inlined_call_operand.hbm [shape: bf16[32,96], index: 1, kind: input, shape index: {}]   ;;  %s331_s2 = inlined_call_operand.hbm [shape: bf16[16,96], index: 2, kind: output, shape index: {}]  }
   0x1   :  { %8 = vsyncpa [#allocation7], 0 }
   0x2   :  { %9 = vsyncpa [#allocation5], 0  ;;  %s258_s9 = smov [#allocation3]   ;;  %s186_s13 = scalar_lea.hbm %s329_s0, 128 }
   0x3   :  { %s15_s10 = sshll.u32 %s258_s9, 4  ;;  %p187_p0 = scmp.ne.s32.totalorder %s329_s0, %s186_s13  ;;  %s16_s10 = int_to_ptr.vmem [resolvable:$true] %s15_s10 }
   0x4   :  { %p190_p1 = scmp.lt.u32.totalorder %s186_s13, %s329_s0 }
   0x6   :  { %p192_p2 = pnand %p190_p1, %p187_p0 }
   0x8   :  { %195 = shalt.err (!%p192_p2)
}
   0x9   :  { %s196_s18 = scalar_lea.vmem %s16_s10, 128  ;;  %p201_p4 = scmp.lt.s32.totalorder %s16_s10, %s16_s10 }
   0xa   :  { %p197_p3 = scmp.ne.s32.totalorder %s16_s10, %s196_s18  ;;  %p202_p5 = scmp.lt.s32.totalorder %s196_s18, %s196_s18 }
   0xc   :  { %p203_p6 = por %p202_p5, %p201_p4 }
   0xe   :  { %p204_p7 = pnand %p203_p6, %p197_p3 }
  0x10   :  { %207 = shalt.err (!%p204_p7)
}
  0x11   :  { %s259_s19 = smov 64   ;;  %s260_s20 = smov 4  }
  0x12   :  { %21 = dma.hbm_to_vmem [thread:$0]  %s329_s0, 128, %s16_s10, [#allocation4], %s259_s19, %s259_s19, %s260_s20  }
  0x13   :  { %s261_s23 = smov [#allocation6]   ;;  %s208_s27 = scalar_lea.hbm %s330_s1, 256 }
  0x14   :  { %s27_s24 = sshll.u32 %s261_s23, 4  ;;  %p209_p8 = scmp.ne.s32.totalorder %s330_s1, %s208_s27  ;;  %s28_s24 = int_to_ptr.vmem [resolvable:$true] %s27_s24 }
  0x15   :  { %p212_p9 = scmp.lt.u32.totalorder %s208_s27, %s330_s1 }
  0x17   :  { %p214_p10 = pnand %p212_p9, %p209_p8 }
  0x19   :  { %217 = shalt.err (!%p214_p10)
}
  0x1a   :  { %s218_s4 = scalar_lea.vmem %s28_s24, 256  ;;  %p223_p12 = scmp.lt.s32.totalorder %s28_s24, %s28_s24 }
  0x1b   :  { %p219_p11 = scmp.ne.s32.totalorder %s28_s24, %s218_s4  ;;  %p224_p13 = scmp.lt.s32.totalorder %s218_s4, %s218_s4 }
  0x1d   :  { %p225_p0 = por %p224_p13, %p223_p12 }
  0x1f   :  { %p226_p1 = pnand %p225_p0, %p219_p11 }
  0x21   :  { %229 = shalt.err (!%p226_p1)
}
  0x22   :  { %33 = dma.hbm_to_vmem [thread:$0]  %s330_s1, 256, %s28_s24, [#allocation7], %s259_s19, %s259_s19, %s260_s20  }
  0x23   :  { %252 = dma.done.wait [#allocation4], 128  }
  0x24   :  { %253 = vsyncadd [#allocation4], 4294967168 }
  0x25   :  { %254 = dma.done.wait [#allocation7], 256  }
  0x26   :  { %255 = vsyncadd [#allocation7], 4294967040  ;;  %vm45_vm0 = vcmask 785408   ;;  %v262_v0 = vmov 0.0   ;;  %vm263_vm1 = vmmov 0   ;;  %v183_v1 = vld [vmem:[#allocation6] sm:$0xff]  }
  0x27   :  { %46 = vst.msk [vmem:[#allocation2] sm:$0xff] %vm45_vm0, %v262_v0  ;;  %47 = vst.msk [vmem:[#allocation2 + $0x8] sm:$0xff] %vm45_vm0, %v262_v0  ;;  %168 = vmatprep.subr.bf16.mxu0 %v262_v0  ;;  %172 = vmatprep.mubr.msk.bf16.mxu0 %vm263_vm1, %v262_v0  ;;  %v184_v2 = vld [vmem:[#allocation6 + $0x8] sm:$0xff]   ;;  %v185_v3 = vld [vmem:[#allocation3] sm:$0xff]   ;;  %vm73_vm2 = vcmask 261120   ;;  %vm136_vm3 = vcmask 781312  }
  0x28   :  { %169 = vmatpush3.bf16.msra.mxu0 %v183_v1  ;;  %s264_s1 = smov [#allocation8]  }
  0x29   :  { %170 = vmatprep.subr.bf16.mxu0 %v262_v0  ;;  %s144_s6 = sshll.u32 %s264_s1, 4  ;;  %s145_s6 = int_to_ptr.vmem [resolvable:$true] %s144_s6 }
  0x2a   :  { %s230_s7 = scalar_lea.vmem %s145_s6, 128  ;;  %p235_p3 = scmp.lt.s32.totalorder %s145_s6, %s145_s6 }
  0x2b   :  { %p231_p2 = scmp.ne.s32.totalorder %s145_s6, %s230_s7  ;;  %p236_p4 = scmp.lt.s32.totalorder %s230_s7, %s230_s7 }
  0x2c   :  { %171 = vmatpush3.bf16.msra.mxu0 %v184_v2 }
  0x2d   :  { %p237_p5 = por %p236_p4, %p235_p3 }
  0x2e   :  { %v48_v4 = vld [vmem:[#allocation2] sm:$0xff]  ;;  %v49_v6 = vld [vmem:[#allocation2 + $0x8] sm:$0xff] }
  0x2f   :  { %173 = vmatmul.mubr.msk.bf16.vlgmr.msra.gmra.mrb[0].mxu0 %vm73_vm2, %v185_v3  ;;  %p238_p6 = pnand %p237_p5, %p231_p2 }
 0x102   :  { %v111_v5 = vpop.f32.mrb[0].mxu0 }
 0x103   :  { %v118_v7 = vadd.f32 %v111_v5, %v48_v4  ;;  %v174_v8 = vpop.f32.mrb[1].mxu0 }
 0x104   :  { %v114_v9 = vpop.f32.mrb[2].mxu0 }
 0x105   :  { %121 = vst.msk [vmem:[#allocation2] sm:$0xff] %vm45_vm0, %v118_v7  ;;  %v119_v10 = vadd.f32 %v114_v9, %v49_v6  ;;  %v175_v11 = vpop.f32.mrb[3].mxu0 }
 0x107   :  { %122 = vst.msk [vmem:[#allocation2 + $0x8] sm:$0xff] %vm45_vm0, %v119_v10 }
 0x10c   :  { %v126_v12 = vld [vmem:[#allocation2] sm:$0xff] }
 0x10d   :  { %v163_v13 = vpack.c.bf16 %v126_v12, %v126_v12 }
 0x10e   :  { %v127_v14 = vld [vmem:[#allocation2 + $0x8] sm:$0xff] }
 0x10f   :  { %v164_v15 = vpack.c.bf16 %v127_v14, %v127_v14  ;;  %137 = vst.msk [vmem:[#allocation8] sm:$0xf] %vm136_vm3, %v163_v13 }
 0x111   :  { %138 = vst.msk [vmem:[#allocation8 + $0x4] sm:$0xf] %vm136_vm3, %v164_v15 }
 0x112   :  { %241 = shalt.err (!%p238_p6)
}
 0x113   :  { %s242_s10 = scalar_lea.hbm %s331_s2, 128 }
 0x114   :  { %p243_p7 = scmp.ne.s32.totalorder %s331_s2, %s242_s10  ;;  %p246_p8 = scmp.lt.u32.totalorder %s242_s10, %s331_s2 }
 0x116   :  { %p248_p9 = pnand %p246_p8, %p243_p7 }
 0x118   :  { %251 = shalt.err (!%p248_p9)
}
 0x119   :  { %150 = dma.vmem_to_hbm [thread:$0]  %s145_s6, 128, %s331_s2, [#allocation5], %s259_s19, %s259_s19, %s260_s20  }
 0x11a   :  { %256 = dma.done.wait [#allocation5], 128  }
 0x11b   :  { %257 = vsyncadd [#allocation5], 4294967168 }
 0x11c   :  { %154 = vsyncpa [#allocation4], 1 }
 0x11d   :  { %155 = vsyncpa [#allocation7], 1 }
 0x11e   :  { %156 = vsyncpa [#allocation5], 1 }

</bundles_post_ra>
